<compile_context>
chip_gen: v7x
topology: tpu7x:2x2x1
jax: 0.10.0
libtpu: 0.0.40
codegen_flags: <defaults>
</compile_context>

<pallas_src>
import math

import jax
import jax.numpy as jnp
from jax.experimental import pallas as pl
from jax.experimental.pallas import tpu as pltpu


# ----------------------------- tiling helpers -----------------------------

def _divisor_tile(n: int, candidates) -> int:
    for c in candidates:
        if n >= c and n % c == 0:
            return c
    return n


def _seq_tile(s: int) -> int:
    # Must exactly divide S (a padded KV edge block would corrupt the softmax).
    return _divisor_tile(s, (512, 256, 128))


def _col_tile(d: int) -> int:
    if d <= 512:
        return d
    return _divisor_tile(d, (512, 256, 128))


def _compiler_params(block_bytes: int, dims) -> pltpu.CompilerParams:
    # Explicit scoped-VMEM limit sized to the actual blocks (+ headroom); the
    # defaults (16 MiB v5e / 32 MiB v6e,v7x) are far below physical VMEM.
    limit = min(int(block_bytes * 1.5) + (8 << 20), 100 << 20)
    return pltpu.CompilerParams(dimension_semantics=dims, vmem_limit_bytes=limit)


# ----------------------------- Pallas kernels -----------------------------

def _linear_kernel(x_ref, w_ref, b_ref, o_ref):
    # x: (TN, Din) @ w: (Din, TD)  -- weights pre-transposed at prepare time so
    # the MXU consumes them directly (no per-grid-step transpose/relayout).
    acc = jnp.dot(x_ref[...], w_ref[...], preferred_element_type=jnp.float32)
    o_ref[...] = (acc + b_ref[...]).astype(o_ref.dtype)


def _flash_attn_kernel(q_ref, k_ref, v_ref, o_ref, m_sc, l_sc, acc_sc):
    # grid = (batch*heads, q-tile, kv-tile); kv (reduction) axis last.
    kv = pl.program_id(2)

    @pl.when(kv == 0)
    def _init():
        m_sc[...] = jnp.full(m_sc.shape, -jnp.inf, dtype=m_sc.dtype)
        l_sc[...] = jnp.zeros(l_sc.shape, dtype=l_sc.dtype)
        acc_sc[...] = jnp.zeros(acc_sc.shape, dtype=acc_sc.dtype)

    q = q_ref[0]          # (TQ, Dh) -- 1/sqrt(Dh) already folded into q projection
    k = k_ref[0]          # (TK, Dh)
    v = v_ref[0]          # (TK, Dh)

    # scores for this KV tile: (TQ, TK); contraction over Dh (k consumed transposed).
    s = jax.lax.dot_general(
        q, k,
        dimension_numbers=(((1,), (1,)), ((), ())),
        preferred_element_type=jnp.float32,
    )

    m_prev = m_sc[...]                                         # (TQ, 1) f32
    m_new = jnp.maximum(m_prev, jnp.max(s, axis=-1, keepdims=True))
    alpha = jnp.exp(m_prev - m_new)
    p = jnp.exp(s - m_new)                                     # (TQ, TK) f32

    l_sc[...] = alpha * l_sc[...] + jnp.sum(p, axis=-1, keepdims=True)
    acc_sc[...] = alpha * acc_sc[...] + jnp.dot(
        p.astype(v.dtype), v, preferred_element_type=jnp.float32)
    m_sc[...] = m_new

    @pl.when(kv == pl.num_programs(2) - 1)
    def _finalize():
        # Exact divide: runs once per output tile (essentially free) and keeps
        # parity with the reference softmax normalization.
        o_ref[0] = (acc_sc[...] / l_sc[...]).astype(o_ref.dtype)


# ------------------------------ Wrappers ------------------------------

def linear(x2d, w_t, b, out_dtype=None):
    """x2d: (N, Din); w_t: (Din, Dout) PRE-transposed; b: (Dout,) -> (N, Dout)."""
    n, d_in = x2d.shape
    d_out = w_t.shape[1]
    out_dtype = out_dtype if out_dtype is not None else x2d.dtype

    tn = min(n, 512)                       # row tile (512 ~ HBM-roofline sweet spot)
    td = _col_tile(d_out)                  # output-column tile (weights streamed)
    grid = (pl.cdiv(n, tn), d_out // td)

    b2 = b.reshape(1, d_out).astype(jnp.float32)

    in_b = jnp.dtype(x2d.dtype).itemsize
    w_b = jnp.dtype(w_t.dtype).itemsize
    out_b = jnp.dtype(out_dtype).itemsize
    block_bytes = 2 * (tn * d_in * in_b + d_in * td * w_b + td * 4 + tn * td * out_b)

    return pl.pallas_call(
        _linear_kernel,
        out_shape=jax.ShapeDtypeStruct((n, d_out), out_dtype),
        grid=grid,
        in_specs=[
            pl.BlockSpec((tn, d_in), lambda i, j: (i, 0)),   # activation rows
            pl.BlockSpec((d_in, td), lambda i, j: (0, j)),   # weight column tile
            pl.BlockSpec((1, td), lambda i, j: (0, j)),      # bias column tile
        ],
        out_specs=pl.BlockSpec((tn, td), lambda i, j: (i, j)),
        compiler_params=_compiler_params(block_bytes, ("parallel", "parallel")),
    )(x2d, w_t, b2)


def flash_attention(q, k, v):
    """q, k, v: (B*H, S, Dh) -> (B*H, S, Dh). Online-softmax, query-tiled."""
    bh, s, dh = q.shape
    tq = _seq_tile(s)
    tk = _seq_tile(s)
    n_q, n_kv = s // tq, s // tk

    itm = jnp.dtype(q.dtype).itemsize
    block_bytes = (2 * (tq * dh + 2 * tk * dh + tq * dh) * itm   # dbl-buffered q/k/v/out
                   + (tq * dh + 2 * tq) * 4)                     # f32 scratch

    q_spec = pl.BlockSpec((1, tq, dh), lambda g, qi, ki: (g, qi, 0))
    kv_spec = pl.BlockSpec((1, tk, dh), lambda g, qi, ki: (g, ki, 0))

    return pl.pallas_call(
        _flash_attn_kernel,
        out_shape=jax.ShapeDtypeStruct((bh, s, dh), q.dtype),
        grid=(bh, n_q, n_kv),                      # reduction (kv) axis last
        in_specs=[q_spec, kv_spec, kv_spec],
        out_specs=pl.BlockSpec((1, tq, dh), lambda g, qi, ki: (g, qi, 0)),
        scratch_shapes=[
            pltpu.VMEM((tq, 1), jnp.float32),      # running max
            pltpu.VMEM((tq, 1), jnp.float32),      # running sum
            pltpu.VMEM((tq, dh), jnp.float32),     # output accumulator
        ],
        compiler_params=_compiler_params(
            block_bytes, ("parallel", "parallel", "arbitrary")),
    )(q, k, v)


# ------------------------- Module (params + forward) -------------------------

def xavier_uniform(key, out_features, in_features, dtype=jnp.float32):
    bound = math.sqrt(6.0 / (in_features + out_features))
    return jax.random.uniform(
        key, (out_features, in_features), dtype=dtype, minval=-bound, maxval=bound)


def init_multihead_attention(key, input_dim, embed_dim):
    kq, kk, kv, ko = jax.random.split(key, 4)
    return {
        "query_proj": {"w": xavier_uniform(kq, embed_dim, input_dim),
                       "b": jnp.zeros((embed_dim,), jnp.float32)},
        "key_proj":   {"w": xavier_uniform(kk, embed_dim, input_dim),
                       "b": jnp.zeros((embed_dim,), jnp.float32)},
        "value_proj": {"w": xavier_uniform(kv, embed_dim, input_dim),
                       "b": jnp.zeros((embed_dim,), jnp.float32)},
        "output_proj": {"w": xavier_uniform(ko, embed_dim, embed_dim),
                        "b": jnp.zeros((embed_dim,), jnp.float32)},
    }


def prepare_mha_params(params, num_heads, compute_dtype=jnp.float32):
    """One-time prep (hoisted out of forward): fuse QKV weights, fold 1/sqrt(Dh)
    into the query projection, pre-transpose to (Din, Dout), cast to compute dtype."""
    embed_dim = params["query_proj"]["w"].shape[0]
    head_dim = embed_dim // num_heads
    scale = 1.0 / math.sqrt(head_dim)

    w_qkv = jnp.concatenate(
        [params["query_proj"]["w"] * scale,
         params["key_proj"]["w"],
         params["value_proj"]["w"]], axis=0).T                 # (Din, 3E)
    b_qkv = jnp.concatenate(
        [params["query_proj"]["b"] * scale,
         params["key_proj"]["b"],
         params["value_proj"]["b"]], axis=0)                   # (3E,)

    return {
        "num_heads": num_heads,
        "embed_dim": embed_dim,
        "w_qkv": w_qkv.astype(compute_dtype),
        "b_qkv": b_qkv.astype(jnp.float32),
        "w_out": params["output_proj"]["w"].T.astype(compute_dtype),   # (E, E)
        "b_out": params["output_proj"]["b"].astype(jnp.float32),
    }


def multihead_attention_forward(prepared, x):
    """x: (B, S, input_dim) -> (B, S, embed_dim). Self-attention, no mask/dropout."""
    b, s, d_in = x.shape
    h = prepared["num_heads"]
    e = prepared["embed_dim"]
    dh = e // h
    cd = prepared["w_qkv"].dtype

    x2d = x.astype(cd).reshape(b * s, d_in)

    # Fused, column-tiled QKV projection (x read once, scale folded into q part).
    qkv = linear(x2d, prepared["w_qkv"], prepared["b_qkv"], out_dtype=cd)  # (B*S, 3E)

    # Split heads out of the lane axis (one-time relayout; attention kernel then
    # works on clean (TQ, Dh)/(TK, Dh) tiles with heads as a grid axis).
    qkv = qkv.reshape(b, s, 3, h, dh)
    q = qkv[:, :, 0].transpose(0, 2, 1, 3).reshape(b * h, s, dh)
    k = qkv[:, :, 1].transpose(0, 2, 1, 3).reshape(b * h, s, dh)
    v = qkv[:, :, 2].transpose(0, 2, 1, 3).reshape(b * h, s, dh)

    attn = flash_attention(q, k, v)                                        # (B*H, S, Dh)
    attn = attn.reshape(b, h, s, dh).transpose(0, 2, 1, 3).reshape(b * s, e)

    out = linear(attn, prepared["w_out"], prepared["b_out"], out_dtype=jnp.float32)
    return out.reshape(b, s, e)


# ------------------------------- Reference -------------------------------

def reference_forward(params, x, num_heads):
    hp = jax.lax.Precision.HIGHEST
    b, s, _ = x.shape
    embed_dim = params["query_proj"]["w"].shape[0]
    head_dim = embed_dim // num_heads

    def lin(t, p):
        return jnp.matmul(t, p["w"].T, precision=hp) + p["b"]

    q = lin(x, params["query_proj"]).reshape(b, s, num_heads, head_dim).transpose(0, 2, 1, 3)
    k = lin(x, params["key_proj"]).reshape(b, s, num_heads, head_dim).transpose(0, 2, 1, 3)
    v = lin(x, params["value_proj"]).reshape(b, s, num_heads, head_dim).transpose(0, 2, 1, 3)

    scores = jnp.einsum("bhqd,bhkd->bhqk", q, k, precision=hp) / math.sqrt(head_dim)
    attn = jax.nn.softmax(scores, axis=-1)
    out = jnp.einsum("bhqk,bhkd->bhqd", attn, v, precision=hp)
    out = out.transpose(0, 2, 1, 3).reshape(b, s, embed_dim)
    return lin(out, params["output_proj"])


# --------------------------------- Main ---------------------------------

if __name__ == "__main__":
    key = jax.random.PRNGKey(0)
    k_params, k_x = jax.random.split(key)

    batch, seq, input_dim, embed_dim, num_heads = 2, 8, 32, 32, 4

    params = init_multihead_attention(k_params, input_dim, embed_dim)
    x = jax.random.normal(k_x, (batch, seq, input_dim), dtype=jnp.float32)

    ref = reference_forward(params, x, num_heads)

    # --- f32 compute path: strict correctness check ---
    prepared_f32 = prepare_mha_params(params, num_heads, jnp.float32)
    out = multihead_attention_forward(prepared_f32, x)
    out = jax.block_until_ready(out)
    assert out.shape == (batch, seq, embed_dim)
    assert jnp.allclose(out, ref, atol=2e-3, rtol=2e-3), "f32 path mismatch vs reference"

    # --- bf16 MXU compute path (f32 accumulation): looser sanity check ---
    prepared_bf16 = prepare_mha_params(params, num_heads, jnp.bfloat16)
    out_bf = multihead_attention_forward(prepared_bf16, x)
    out_bf = jax.block_until_ready(out_bf)
    assert out_bf.shape == (batch, seq, embed_dim)
    assert jnp.allclose(out_bf, ref, atol=1.5e-1, rtol=1.5e-1), "bf16 path mismatch vs reference"

    print("KERNEL_OK")
</pallas_src>

<mosaic_0001>
module attributes {stable_mosaic.version = 11 : i64} {
  func.func @_linear_kernel(%arg0: i32, %arg1: i32, %arg2: memref<16x32xf32, #tpu.memory_space<vmem>>, %arg3: memref<32x96xf32, #tpu.memory_space<vmem>>, %arg4: memref<1x96xf32, #tpu.memory_space<vmem>>, %arg5: memref<16x96xf32, #tpu.memory_space<vmem>>) attributes {dimension_semantics = [#tpu.dimension_semantics<parallel>, #tpu.dimension_semantics<parallel>], iteration_bounds = array<i64: 1, 1>, scalar_prefetch = 0 : i64, scratch_operands = 0 : i64, tpu.core_type = #tpu.core_type<tc>, window_params = [{transform_indices = @transform_0, window_bounds = array<i64: 16, 32>}, {transform_indices = @transform_1, window_bounds = array<i64: 32, 96>}, {transform_indices = @transform_2, window_bounds = array<i64: 1, 96>}, {transform_indices = @transform_3, window_bounds = array<i64: 16, 96>}]} {
    %c0 = arith.constant 0 : index
    %c0_0 = arith.constant 0 : index
    %0 = vector.load %arg2[%c0, %c0_0] : memref<16x32xf32, #tpu.memory_space<vmem>>, vector<16x32xf32>
    %c0_1 = arith.constant 0 : index
    %c0_2 = arith.constant 0 : index
    %1 = vector.load %arg3[%c0_1, %c0_2] : memref<32x96xf32, #tpu.memory_space<vmem>>, vector<32x96xf32>
    %cst = arith.constant dense<0.000000e+00> : vector<16x96xf32>
    %2 = tpu.matmul %0, %1, %cst {dimension_numbers = #tpu.dot_dimension_numbers<[1], [0], [0], [1], [0, 0, 1, 1], [], []>} : vector<16x32xf32>, vector<32x96xf32>, vector<16x96xf32> -> vector<16x96xf32>
    %c0_3 = arith.constant 0 : index
    %c0_4 = arith.constant 0 : index
    %3 = vector.load %arg4[%c0_3, %c0_4] : memref<1x96xf32, #tpu.memory_space<vmem>>, vector<1x96xf32>
    %4 = vector.broadcast %3 : vector<1x96xf32> to vector<16x96xf32>
    %5 = arith.addf %2, %4 : vector<16x96xf32>
    %c0_5 = arith.constant 0 : index
    %c0_6 = arith.constant 0 : index
    %6 = vector.load %arg5[%c0_5, %c0_6] : memref<16x96xf32, #tpu.memory_space<vmem>>, vector<16x96xf32>
    tpu.vector_store %arg5[%c0_5, %c0_6], %5 {strides = array<i32>} : memref<16x96xf32, #tpu.memory_space<vmem>>, vector<16x96xf32>,
    return
  }
  func.func @transform_0(%arg0: i32, %arg1: i32) -> (i32, i32) {
    %c0_i32 = arith.constant 0 : i32
    %c0_i32_0 = arith.constant 0 : i32
    return %arg0, %c0_i32 : i32, i32
  }
  func.func @transform_1(%arg0: i32, %arg1: i32) -> (i32, i32) {
    %c0_i32 = arith.constant 0 : i32
    %c0_i32_0 = arith.constant 0 : i32
    return %c0_i32, %arg1 : i32, i32
  }
  func.func @transform_2(%arg0: i32, %arg1: i32) -> (i32, i32) {
    %c0_i32 = arith.constant 0 : i32
    %c0_i32_0 = arith.constant 0 : i32
    return %c0_i32, %arg1 : i32, i32
  }
  func.func @transform_3(%arg0: i32, %arg1: i32) -> (i32, i32) {
    %c0_i32 = arith.constant 0 : i32
    return %arg0, %arg1 : i32, i32
  }
}

</mosaic_0001>

<bundles_post_ra>
// kernel: tpu_custom_call.1
= control target key start
LH: loop header
LB: loop body
LE: loop exit
PB: predicated region body
PF: predicated region fallthrough
CT: control target
= control target key end

     0   :  { %8 = vsyncpa [#allocation3], 0  ;;  %s337_s0 = inlined_call_operand.hbm [shape: f32[16,32], index: 0, kind: input, shape index: {}]   ;;  %s338_s1 = inlined_call_operand.hbm [shape: f32[32,96], index: 1, kind: input, shape index: {}]   ;;  %s339_s2 = inlined_call_operand.vmem [shape: f32[1,96], index: 2, kind: input, shape index: {}]   ;;  %s340_s3 = inlined_call_operand.hbm [shape: f32[16,96], index: 3, kind: output, shape index: {}]  }
   0x1   :  { %9 = vsyncpa [#allocation6], 0 }
   0x2   :  { %10 = vsyncpa [#allocation4], 0  ;;  %s264_s12 = smov [#allocation2]   ;;  %s192_s16 = scalar_lea.hbm %s337_s0, 256 }
   0x3   :  { %s16_s13 = sshll.u32 %s264_s12, 4  ;;  %p193_p0 = scmp.ne.s32.totalorder %s337_s0, %s192_s16  ;;  %s17_s13 = int_to_ptr.vmem [resolvable:$true] %s16_s13 }
   0x4   :  { %p196_p1 = scmp.lt.u32.totalorder %s192_s16, %s337_s0 }
   0x6   :  { %p198_p2 = pnand %p196_p1, %p193_p0 }
   0x8   :  { %201 = shalt.err (!%p198_p2)
}
   0x9   :  { %s202_s21 = scalar_lea.vmem %s17_s13, 256  ;;  %p207_p4 = scmp.lt.s32.totalorder %s17_s13, %s17_s13 }
   0xa   :  { %p203_p3 = scmp.ne.s32.totalorder %s17_s13, %s202_s21  ;;  %p208_p5 = scmp.lt.s32.totalorder %s202_s21, %s202_s21 }
   0xc   :  { %p209_p6 = por %p208_p5, %p207_p4 }
   0xe   :  { %p210_p7 = pnand %p209_p6, %p203_p3 }
  0x10   :  { %213 = shalt.err (!%p210_p7)
}
  0x11   :  { %s265_s22 = smov 128   ;;  %s266_s23 = smov 8  }
  0x12   :  { %22 = dma.hbm_to_vmem [thread:$0]  %s337_s0, 256, %s17_s13, [#allocation3], %s265_s22, %s265_s22, %s266_s23  }
  0x13   :  { %s267_s26 = smov [#allocation5]   ;;  %s214_s30 = scalar_lea.hbm %s338_s1, 512 }
  0x14   :  { %s28_s27 = sshll.u32 %s267_s26, 4  ;;  %p215_p8 = scmp.ne.s32.totalorder %s338_s1, %s214_s30  ;;  %s29_s27 = int_to_ptr.vmem [resolvable:$true] %s28_s27 }
  0x15   :  { %p218_p9 = scmp.lt.u32.totalorder %s214_s30, %s338_s1 }
  0x17   :  { %p220_p10 = pnand %p218_p9, %p215_p8 }
  0x19   :  { %223 = shalt.err (!%p220_p10)
}
  0x1a   :  { %s224_s8 = scalar_lea.vmem %s29_s27, 512  ;;  %p229_p12 = scmp.lt.s32.totalorder %s29_s27, %s29_s27 }
  0x1b   :  { %p225_p11 = scmp.ne.s32.totalorder %s29_s27, %s224_s8  ;;  %p230_p13 = scmp.lt.s32.totalorder %s224_s8, %s224_s8 }
  0x1d   :  { %p231_p0 = por %p230_p13, %p229_p12 }
  0x1f   :  { %p232_p1 = pnand %p231_p0, %p225_p11 }
  0x21   :  { %235 = shalt.err (!%p232_p1)
}
  0x22   :  { %34 = dma.hbm_to_vmem [thread:$0]  %s338_s1, 512, %s29_s27, [#allocation6], %s265_s22, %s265_s22, %s266_s23  }
  0x23   :  { %258 = dma.done.wait [#allocation3], 256  }
  0x24   :  { %259 = vsyncadd [#allocation3], 4294967040 }
  0x25   :  { %260 = dma.done.wait [#allocation6], 512  }
  0x26   :  { %261 = vsyncadd [#allocation6], 4294966784  ;;  %vm56_vm0 = vcmask 261120   ;;  %v45_v0 = vld [vmem:[#allocation5] sm:$0xff]  ;;  %v46_v1 = vld [vmem:[#allocation5 + $0x8] sm:$0xff]  ;;  %s268_s11 = smov [#allocation7]  }
  0x27   :  { %v47_v2 = vld [vmem:[#allocation5 + $0x10] sm:$0xff]  ;;  %v179_v3 = vpack.c.bf16 %v46_v1, %v45_v0  ;;  %v48_v4 = vld [vmem:[#allocation5 + $0x18] sm:$0xff]  ;;  %s146_s12 = sshll.u32 %s268_s11, 4  ;;  %vm138_vm1 = vcmask 785408   ;;  %s147_s12 = int_to_ptr.vmem [resolvable:$true] %s146_s12 }
  0x28   :  { %v43_v5 = vld [vmem:[#allocation2] sm:$0xff]  ;;  %v183_v6 = vpack.c.bf16 %v48_v4, %v47_v2  ;;  %v44_v7 = vld [vmem:[#allocation2 + $0x8] sm:$0xff]  ;;  %s236_s13 = scalar_lea.vmem %s147_s12, 256  ;;  %p241_p3 = scmp.lt.s32.totalorder %s147_s12, %s147_s12 }
  0x29   :  { %176 = vmatprep.mubr.msk.f32.mxu0 %vm56_vm0, %v43_v5  ;;  %180 = vmatprep.subr.bf16.mxu0 %v179_v3  ;;  %v159_v8 = vld [vmem:[%s339_s2] ss:$0 sm:$0xff]  ;;  %p237_p2 = scmp.ne.s32.totalorder %s147_s12, %s236_s13  ;;  %p242_p4 = scmp.lt.s32.totalorder %s236_s13, %s236_s13 }
  0x2a   :  { %182 = vmatpush3.bf16.msra.mxu0 %v179_v3 }
  0x2b   :  { %184 = vmatprep.subr.bf16.mxu0 %v183_v6  ;;  %p243_p5 = por %p242_p4, %p241_p3 }
  0x2d   :  { %p244_p6 = pnand %p243_p5, %p237_p2 }
  0x2e   :  { %186 = vmatpush3.bf16.msra.mxu0 %v183_v6 }
  0x31   :  { %177 = vmatmul.mubr.msk.f32.vlgmr.msra.gmra.mrb[0].mxu0 %vm56_vm0, %v44_v7 }
 0x104   :  { %v178_v9 = vpop.f32.mrb[0].mxu0 }
 0x105   :  { %v135_v10 = vadd.f32 %v178_v9, %v159_v8  ;;  %v129_v11 = vpop.f32.mrb[1].mxu0 }
 0x106   :  { %v130_v12 = vadd.f32 %v159_v8, %v129_v11 }
 0x107   :  { %140 = vst.msk [vmem:[#allocation7 + $0x8] sm:$0xff] %vm138_vm1, %v135_v10 }
 0x108   :  { %139 = vst.msk [vmem:[#allocation7] sm:$0xff] %vm138_vm1, %v130_v12 }
 0x109   :  { %247 = shalt.err (!%p244_p6)
}
 0x10a   :  { %s248_s2 = scalar_lea.hbm %s340_s3, 256 }
 0x10b   :  { %p249_p7 = scmp.ne.s32.totalorder %s340_s3, %s248_s2  ;;  %p252_p8 = scmp.lt.u32.totalorder %s248_s2, %s340_s3 }
 0x10d   :  { %p254_p9 = pnand %p252_p8, %p249_p7 }
 0x10f   :  { %257 = shalt.err (!%p254_p9)
}
 0x110   :  { %152 = dma.vmem_to_hbm [thread:$0]  %s147_s12, 256, %s340_s3, [#allocation4], %s265_s22, %s265_s22, %s266_s23  }
 0x111   :  { %262 = dma.done.wait [#allocation4], 256  }
 0x112   :  { %263 = vsyncadd [#allocation4], 4294967040 }
 0x113   :  { %156 = vsyncpa [#allocation3], 1 }
 0x114   :  { %157 = vsyncpa [#allocation6], 1 }
 0x115   :  { %158 = vsyncpa [#allocation4], 1 }

</bundles_post_ra>
